<compile_context>
chip_gen: v7x
topology: tpu7x:2x2x1
jax: 0.10.0
libtpu: 0.0.40
codegen_flags: <defaults>
</compile_context>

<pallas_src>
import numpy as np
import jax
import jax.numpy as jnp
from jax.experimental import pallas as pl
from jax.experimental.pallas import tpu as pltpu

EPS = 1e-10
MASK_BIAS = -1e30          # additive masked_fill surrogate (no NaN on all-masked rows)
K_SAMPLES = 5              # AdversaryMulti.K
STATS_LANES = 128          # single lane-dense stats row per batch element
# Cyclic shifts d such that pairs (i, (i+d) % K), d in _PAIR_SHIFTS, i in [0,K)
# enumerate every unordered pair {i, j}, i != j, exactly once (true for K = 5).
_PAIR_SHIFTS = (1, 2)


def _pairs(K):
    return [(i, (i + d) % K) for d in _PAIR_SHIFTS for i in range(K)]


def _softmax_last(x):
    """Row softmax; one exact reciprocal per row + VPU multiply instead of a
    broadcast divide over every element."""
    m = jnp.max(x, axis=-1, keepdims=True)
    e = jnp.exp(x - m)
    inv = pl.reciprocal(jnp.sum(e, axis=-1, keepdims=True), approx=False)
    return e * inv


def _cyclic_shift(x, d, axis):
    """x rolled by -d along `axis` (two static slices + one concatenate)."""
    hi = [slice(None)] * x.ndim
    lo = [slice(None)] * x.ndim
    hi[axis] = slice(d, None)
    lo[axis] = slice(0, d)
    return jnp.concatenate([x[tuple(hi)], x[tuple(lo)]], axis=axis)


def adversary_kernel(log_attn_ref, mask_ref, attn_ref, pred_new_ref, pred_ref,
                     attn_vol_ref, stats_ref):
    la = log_attn_ref[...]          # (Bt, K, L)
    mask = mask_ref[...]            # (Bt, L)   1.0 where masked
    q_attn = attn_ref[...]          # (Bt, L)   original attention (detached)
    pn = pred_new_ref[...]          # (Bt, K, C) "decoder" outputs
    po = pred_ref[...]              # (Bt, C)   original prediction logits

    bt, K, _L = la.shape
    SL = stats_ref.shape[-1]
    n_pairs = len(_PAIR_SHIFTS) * K

    # masked_fill_(masks.unsqueeze(1), -inf) ; Softmax(dim=-1)
    # (additive large-negative bias: one VPU add; masked lanes underflow to 0.0)
    la = la + mask[:, None, :] * MASK_BIAS
    p = _softmax_last(la)                                   # (Bt, K, L)
    attn_vol_ref[...] = p

    stats_ref[...] = jnp.zeros((bt, SL), jnp.float32)

    # ---- JS divergence, algebraically restructured -------------------------
    # js(p, q) = 0.5*(S_p + S_q) - sum_L m*log(m+eps),  m = 0.5*(p+q),
    # with S_x = sum_L x*log(x+eps): each log over L computed exactly once.
    s_p = jnp.sum(p * jnp.log(p + EPS), axis=-1)            # (Bt, K)
    s_q = jnp.sum(q_attn * jnp.log(q_attn + EPS), axis=-1, keepdims=True)

    m1 = 0.5 * (p + q_attn[:, None, :])                     # (Bt, K, L)
    jsd = 0.5 * (s_p + s_q) - jnp.sum(m1 * jnp.log(m1 + EPS), axis=-1)   # (Bt, K)

    # ---- cross JSD: only the unique pairs, via 2 cyclic shifts of p ---------
    cross_sum = jnp.zeros((bt, 1), jnp.float32)
    for di, d in enumerate(_PAIR_SHIFTS):
        p_s = _cyclic_shift(p, d, axis=1)                   # (Bt, K, L)
        s_s = _cyclic_shift(s_p, d, axis=1)                 # (Bt, K)
        m_c = 0.5 * (p + p_s)
        ent = jnp.sum(m_c * jnp.log(m_c + EPS), axis=-1)    # (Bt, K)
        chunk = 0.5 * (s_p + s_s) - ent                     # pair (i, (i+d)%K)
        stats_ref[:, 2 * K + di * K:2 * K + (di + 1) * K] = chunk
        cross_sum = cross_sum + jnp.sum(chunk, axis=-1, keepdims=True)

    # ---- output_diff + ReLU(y_diff - 0.01) ---------------------------------
    sp_n = _softmax_last(pn)                                # (Bt, K, C)
    sp_o = _softmax_last(po)                                # (Bt, C)
    y_diff = jnp.sum(jnp.abs(sp_n - sp_o[:, None, :]), axis=-1)   # (Bt, K)
    diff = jnp.maximum(y_diff - 0.01, 0.0)

    # per-batch loss contribution (loss is additive over the batch);
    # full K x K cross sum = 2 * sum over unique pairs (diagonal is 0).
    loss_b = (jnp.sum(-jsd + 500.0 * diff, axis=-1, keepdims=True)
              - 2.0 * cross_sum / float(K * K))             # (Bt, 1)

    # ---- pack remaining stats into the lane-dense (Bt, SL) row -------------
    stats_ref[:, 0:K] = jsd
    stats_ref[:, K:2 * K] = diff
    stats_ref[:, 2 * K + n_pairs:2 * K + n_pairs + 1] = loss_b


def _pick_block_b(B, cap=64):
    """Batch elements per grid step.

    The cap keeps double-buffered tiles plus live intermediates (~60 KB per
    batch element) far below the 32 MiB default scoped VMEM (and v7x's smaller
    physical VMEM) while amortizing the ~0.35us per-step overhead.  Prefer
    multiples of 8 so the 2-D (Bt, .) tiles stay sublane-dense."""
    if B <= cap:
        return B
    for bt in range(cap - cap % 8, 7, -8):
        if B % bt == 0:
            return bt
    for bt in range(cap, 0, -1):     # fallback: any divisor
        if B % bt == 0:
            return bt
    return 1


def adversary_step(log_attn, masks, attn, predict_new, predict, block_b=None):
    """One forward evaluation of the AdversaryMulti objective.

    log_attn:    (B, K, L) float32
    masks:       (B, L)    bool / {0,1}   (1 = masked)
    attn:        (B, L)    float32        (original attention, detached)
    predict_new: (B, K, C) float32        (decoder output stand-in)
    predict:     (B, C)    float32        (original prediction, detached)
    """
    B, K, L = log_attn.shape
    C = predict.shape[-1]
    SL = STATS_LANES

    prs = _pairs(K)
    n_pairs = len(prs)
    assert len({frozenset(pr) for pr in prs}) == n_pairs == K * (K - 1) // 2, \
        "_PAIR_SHIFTS must enumerate each unordered pair exactly once for this K"
    assert 2 * K + n_pairs + 1 <= SL, "stats row too small for K"

    if block_b is None:
        block_b = _pick_block_b(B)
    assert B % block_b == 0
    grid = (B // block_b,)

    masks2 = masks.reshape(B, L).astype(jnp.float32)
    attn2 = attn.reshape(B, L).astype(jnp.float32)
    pred2 = predict.reshape(B, C).astype(jnp.float32)

    out_shapes = (
        jax.ShapeDtypeStruct((B, K, L), jnp.float32),   # attn_volatile
        jax.ShapeDtypeStruct((B, SL), jnp.float32),     # packed stats row
    )

    attn_vol, stats = pl.pallas_call(
        adversary_kernel,
        out_shape=out_shapes,
        grid=grid,
        in_specs=[
            pl.BlockSpec((block_b, K, L), lambda b: (b, 0, 0)),
            pl.BlockSpec((block_b, L), lambda b: (b, 0)),
            pl.BlockSpec((block_b, L), lambda b: (b, 0)),
            pl.BlockSpec((block_b, K, C), lambda b: (b, 0, 0)),
            pl.BlockSpec((block_b, C), lambda b: (b, 0)),
        ],
        out_specs=(
            pl.BlockSpec((block_b, K, L), lambda b: (b, 0, 0)),
            pl.BlockSpec((block_b, SL), lambda b: (b, 0)),
        ),
        compiler_params=pltpu.CompilerParams(
            dimension_semantics=("parallel",),
            vmem_limit_bytes=32 * 1024 * 1024),
    )(log_attn.astype(jnp.float32), masks2, attn2,
      predict_new.astype(jnp.float32), pred2)

    # ---- unpack the lane-dense stats row (cheap wrapper-side slices) -------
    jsd = stats[:, 0:K][..., None]                       # (B, K, 1)
    diff = stats[:, K:2 * K][..., None]                  # (B, K, 1)
    pair_vals = stats[:, 2 * K:2 * K + n_pairs]          # (B, n_pairs)
    loss = jnp.sum(stats[:, 2 * K + n_pairs])            # scalar

    # rebuild the full symmetric (B, K, K) cross-JSD (diagonal exactly 0)
    scat = np.zeros((n_pairs, K * K), np.float32)
    for pi, (i, j) in enumerate(prs):
        scat[pi, i * K + j] = 1.0
        scat[pi, j * K + i] = 1.0
    cross = (pair_vals @ jnp.asarray(scat)).reshape(B, K, K)

    return attn_vol, jsd, diff, cross, loss


# --------------------------- pure-JAX reference ------------------------------

def _kld_ref(a1, a2):
    a1 = jnp.clip(a1, 0.0, 1.0)
    a2 = jnp.clip(a2, 0.0, 1.0)
    return jnp.sum(a1 * (jnp.log(a1 + EPS) - jnp.log(a2 + EPS)), axis=-1)


def _js_ref(p, q):
    m = 0.5 * (p + q)
    return 0.5 * (_kld_ref(p, m) + _kld_ref(q, m))


def _reference(log_attn, masks, attn, predict_new, predict):
    la = jnp.where(masks[:, None, :] > 0, -jnp.inf, log_attn)
    p = jax.nn.softmax(la, axis=-1)                                   # (B,K,L)
    jsd = _js_ref(p, attn[:, None, :])[..., None]                     # (B,K,1)
    y_diff = jnp.sum(jnp.abs(jax.nn.softmax(predict_new, axis=-1) -
                             jax.nn.softmax(predict, axis=-1)[:, None, :]),
                     axis=-1, keepdims=True)                          # (B,K,1)
    diff = jnp.maximum(y_diff - 0.01, 0.0)
    cross = _js_ref(p[:, :, None, :], p[:, None, :, :])               # (B,K,K)
    loss = jnp.sum(-jsd + 500.0 * diff) - jnp.mean(jnp.sum(cross, axis=0))
    return p, jsd, diff, cross, loss


if __name__ == "__main__":
    B, K, L, C = 2, K_SAMPLES, 128, 16
    key = jax.random.PRNGKey(0)
    k_noise, k_attn, k_pn, k_p = jax.random.split(key, 4)

    # deterministic "data" construction, mirroring the module's setup
    lengths = jnp.array([100, 120], dtype=jnp.int32)                  # (B,)
    pos = jnp.arange(L)[None, :]
    masks = (pos >= lengths[:, None])                                 # (B, L) bool

    # new_attn = log(uniform_attn).unsqueeze(1).repeat(1, K, 1) + randn*3
    uniform_attn = 1.0 / lengths.astype(jnp.float32)                  # (B,)
    log_attn = (jnp.log(uniform_attn)[:, None, None]
                * jnp.ones((B, K, L), jnp.float32)
                + jax.random.normal(k_noise, (B, K, L)) * 3.0)

    # original (detached) attention: masked softmax of random logits
    attn_logits = jnp.where(masks, -jnp.inf,
                            jax.random.normal(k_attn, (B, L)))
    attn = jax.nn.softmax(attn_logits, axis=-1)

    # decoder output stand-ins (see TODO(synk) above)
    predict_new = jax.random.normal(k_pn, (B, K, C))
    predict = jax.random.normal(k_p, (B, C))

    masks_f = masks.astype(jnp.float32)
    outs = adversary_step(log_attn, masks_f, attn, predict_new, predict)
    outs = jax.block_until_ready(outs)

    # sanity check against the pure-JAX reference
    ref = _reference(log_attn, masks_f, attn, predict_new, predict)
    for got, want in zip(outs, ref):
        assert jnp.allclose(got, want, rtol=1e-4, atol=1e-4), (got, want)

    print("KERNEL_OK")
</pallas_src>

<mosaic_0001>
module attributes {stable_mosaic.version = 11 : i64} {
  func.func @adversary_kernel(%arg0: i32, %arg1: memref<2x5x128xf32, #tpu.memory_space<vmem>>, %arg2: memref<2x128xf32, #tpu.memory_space<vmem>>, %arg3: memref<2x128xf32, #tpu.memory_space<vmem>>, %arg4: memref<2x5x16xf32, #tpu.memory_space<vmem>>, %arg5: memref<2x16xf32, #tpu.memory_space<vmem>>, %arg6: memref<2x5x128xf32, #tpu.memory_space<vmem>>, %arg7: memref<2x128xf32, #tpu.memory_space<vmem>>) attributes {dimension_semantics = [#tpu.dimension_semantics<parallel>], iteration_bounds = array<i64: 1>, scalar_prefetch = 0 : i64, scratch_operands = 0 : i64, tpu.core_type = #tpu.core_type<tc>, window_params = [{transform_indices = @transform_0, window_bounds = array<i64: 2, 5, 128>}, {transform_indices = @transform_1, window_bounds = array<i64: 2, 128>}, {transform_indices = @transform_2, window_bounds = array<i64: 2, 128>}, {transform_indices = @transform_3, window_bounds = array<i64: 2, 5, 16>}, {transform_indices = @transform_4, window_bounds = array<i64: 2, 16>}, {transform_indices = @transform_5, window_bounds = array<i64: 2, 5, 128>}, {transform_indices = @transform_6, window_bounds = array<i64: 2, 128>}]} {
    %c0 = arith.constant 0 : index
    %c0_0 = arith.constant 0 : index
    %c0_1 = arith.constant 0 : index
    %0 = vector.load %arg1[%c0, %c0_0, %c0_1] : memref<2x5x128xf32, #tpu.memory_space<vmem>>, vector<2x5x128xf32>
    %c0_2 = arith.constant 0 : index
    %c0_3 = arith.constant 0 : index
    %1 = vector.load %arg2[%c0_2, %c0_3] : memref<2x128xf32, #tpu.memory_space<vmem>>, vector<2x128xf32>
    %c0_4 = arith.constant 0 : index
    %c0_5 = arith.constant 0 : index
    %2 = vector.load %arg3[%c0_4, %c0_5] : memref<2x128xf32, #tpu.memory_space<vmem>>, vector<2x128xf32>
    %c0_6 = arith.constant 0 : index
    %c0_7 = arith.constant 0 : index
    %c0_8 = arith.constant 0 : index
    %3 = vector.load %arg4[%c0_6, %c0_7, %c0_8] : memref<2x5x16xf32, #tpu.memory_space<vmem>>, vector<2x5x16xf32>
    %c0_9 = arith.constant 0 : index
    %c0_10 = arith.constant 0 : index
    %4 = vector.load %arg5[%c0_9, %c0_10] : memref<2x16xf32, #tpu.memory_space<vmem>>, vector<2x16xf32>
    %5 = vector.shape_cast %1 : vector<2x128xf32> to vector<2x1x128xf32>
    %cst = arith.constant -1.000000e+30 : f32
    %6 = vector.broadcast %cst : f32 to vector<2x1x128xf32>
    %7 = arith.mulf %5, %6 : vector<2x1x128xf32>
    %8 = vector.broadcast %7 : vector<2x1x128xf32> to vector<2x5x128xf32>
    %9 = arith.addf %0, %8 : vector<2x5x128xf32>
    %cst_11 = arith.constant dense<0xFF800000> : vector<2x5xf32>
    %10 = vector.multi_reduction <maximumf>, %9, %cst_11 [2] : vector<2x5x128xf32> to vector<2x5xf32>
    %11 = vector.shape_cast %10 : vector<2x5xf32> to vector<2x5x1xf32>
    %12 = vector.broadcast %11 : vector<2x5x1xf32> to vector<2x5x128xf32>
    %13 = arith.subf %9, %12 : vector<2x5x128xf32>
    %14 = math.exp %13 : vector<2x5x128xf32>
    %cst_12 = arith.constant dense<0.000000e+00> : vector<2x5xf32>
    %15 = vector.multi_reduction <add>, %14, %cst_12 [2] : vector<2x5x128xf32> to vector<2x5xf32>
    %16 = vector.shape_cast %15 : vector<2x5xf32> to vector<2x5x1xf32>
    %17 = tpu.reciprocal %16 : vector<2x5x1xf32> -> vector<2x5x1xf32>
    %18 = vector.broadcast %17 : vector<2x5x1xf32> to vector<2x5x128xf32>
    %19 = arith.mulf %14, %18 : vector<2x5x128xf32>
    %c0_13 = arith.constant 0 : index
    %c0_14 = arith.constant 0 : index
    %c0_15 = arith.constant 0 : index
    %20 = vector.load %arg6[%c0_13, %c0_14, %c0_15] : memref<2x5x128xf32, #tpu.memory_space<vmem>>, vector<2x5x128xf32>
    tpu.vector_store %arg6[%c0_13, %c0_14, %c0_15], %19 {strides = array<i32>} : memref<2x5x128xf32, #tpu.memory_space<vmem>>, vector<2x5x128xf32>,
    %cst_16 = arith.constant 0.000000e+00 : f32
    %21 = vector.broadcast %cst_16 : f32 to vector<2x128xf32>
    %c0_17 = arith.constant 0 : index
    %c0_18 = arith.constant 0 : index
    %22 = vector.load %arg7[%c0_17, %c0_18] : memref<2x128xf32, #tpu.memory_space<vmem>>, vector<2x128xf32>
    tpu.vector_store %arg7[%c0_17, %c0_18], %21 {strides = array<i32>} : memref<2x128xf32, #tpu.memory_space<vmem>>, vector<2x128xf32>,
    %cst_19 = arith.constant 1.000000e-10 : f32
    %23 = vector.broadcast %cst_19 : f32 to vector<2x5x128xf32>
    %24 = arith.addf %19, %23 : vector<2x5x128xf32>
    %25 = math.log %24 : vector<2x5x128xf32>
    %26 = arith.mulf %19, %25 : vector<2x5x128xf32>
    %cst_20 = arith.constant dense<0.000000e+00> : vector<2x5xf32>
    %27 = vector.multi_reduction <add>, %26, %cst_20 [2] : vector<2x5x128xf32> to vector<2x5xf32>
    %cst_21 = arith.constant 1.000000e-10 : f32
    %28 = vector.broadcast %cst_21 : f32 to vector<2x128xf32>
    %29 = arith.addf %2, %28 : vector<2x128xf32>
    %30 = math.log %29 : vector<2x128xf32>
    %31 = arith.mulf %2, %30 : vector<2x128xf32>
    %cst_22 = arith.constant dense<0.000000e+00> : vector<2xf32>
    %32 = vector.multi_reduction <add>, %31, %cst_22 [1] : vector<2x128xf32> to vector<2xf32>
    %33 = vector.shape_cast %32 : vector<2xf32> to vector<2x1xf32>
    %34 = vector.shape_cast %2 : vector<2x128xf32> to vector<2x1x128xf32>
    %35 = vector.broadcast %34 : vector<2x1x128xf32> to vector<2x5x128xf32>
    %36 = arith.addf %19, %35 : vector<2x5x128xf32>
    %cst_23 = arith.constant 5.000000e-01 : f32
    %37 = vector.broadcast %cst_23 : f32 to vector<2x5x128xf32>
    %38 = arith.mulf %37, %36 : vector<2x5x128xf32>
    %39 = vector.broadcast %33 : vector<2x1xf32> to vector<2x5xf32>
    %40 = arith.addf %27, %39 : vector<2x5xf32>
    %cst_24 = arith.constant 5.000000e-01 : f32
    %41 = vector.broadcast %cst_24 : f32 to vector<2x5xf32>
    %42 = arith.mulf %41, %40 : vector<2x5xf32>
    %cst_25 = arith.constant 1.000000e-10 : f32
    %43 = vector.broadcast %cst_25 : f32 to vector<2x5x128xf32>
    %44 = arith.addf %38, %43 : vector<2x5x128xf32>
    %45 = math.log %44 : vector<2x5x128xf32>
    %46 = arith.mulf %38, %45 : vector<2x5x128xf32>
    %cst_26 = arith.constant dense<0.000000e+00> : vector<2x5xf32>
    %47 = vector.multi_reduction <add>, %46, %cst_26 [2] : vector<2x5x128xf32> to vector<2x5xf32>
    %48 = arith.subf %42, %47 : vector<2x5xf32>
    %cst_27 = arith.constant 0.000000e+00 : f32
    %49 = vector.broadcast %cst_27 : f32 to vector<2x1xf32>
    %50 = vector.extract_strided_slice %19 {offsets = [0, 1, 0], sizes = [2, 4, 128], strides = [1, 1, 1]} : vector<2x5x128xf32> to vector<2x4x128xf32>
    %51 = vector.extract_strided_slice %19 {offsets = [0, 0, 0], sizes = [2, 1, 128], strides = [1, 1, 1]} : vector<2x5x128xf32> to vector<2x1x128xf32>
    %52 = tpu.concatenate %50, %51 in 1 : vector<2x4x128xf32>, vector<2x1x128xf32> -> vector<2x5x128xf32>
    %53 = vector.extract_strided_slice %27 {offsets = [0, 1], sizes = [2, 4], strides = [1, 1]} : vector<2x5xf32> to vector<2x4xf32>
    %54 = vector.extract_strided_slice %27 {offsets = [0, 0], sizes = [2, 1], strides = [1, 1]} : vector<2x5xf32> to vector<2x1xf32>
    %55 = tpu.concatenate %53, %54 in 1 : vector<2x4xf32>, vector<2x1xf32> -> vector<2x5xf32>
    %56 = arith.addf %19, %52 : vector<2x5x128xf32>
    %cst_28 = arith.constant 5.000000e-01 : f32
    %57 = vector.broadcast %cst_28 : f32 to vector<2x5x128xf32>
    %58 = arith.mulf %57, %56 : vector<2x5x128xf32>
    %cst_29 = arith.constant 1.000000e-10 : f32
    %59 = vector.broadcast %cst_29 : f32 to vector<2x5x128xf32>
    %60 = arith.addf %58, %59 : vector<2x5x128xf32>
    %61 = math.log %60 : vector<2x5x128xf32>
    %62 = arith.mulf %58, %61 : vector<2x5x128xf32>
    %cst_30 = arith.constant dense<0.000000e+00> : vector<2x5xf32>
    %63 = vector.multi_reduction <add>, %62, %cst_30 [2] : vector<2x5x128xf32> to vector<2x5xf32>
    %64 = arith.addf %27, %55 : vector<2x5xf32>
    %cst_31 = arith.constant 5.000000e-01 : f32
    %65 = vector.broadcast %cst_31 : f32 to vector<2x5xf32>
    %66 = arith.mulf %65, %64 : vector<2x5xf32>
    %67 = arith.subf %66, %63 : vector<2x5xf32>
    %c0_32 = arith.constant 0 : index
    %c10 = arith.constant 10 : index
    %68 = vector.load %arg7[%c0_32, %c10] : memref<2x128xf32, #tpu.memory_space<vmem>>, vector<2x5xf32>
    tpu.vector_store %arg7[%c0_32, %c10], %67 {strides = array<i32>} : memref<2x128xf32, #tpu.memory_space<vmem>>, vector<2x5xf32>,
    %cst_33 = arith.constant dense<0.000000e+00> : vector<2xf32>
    %69 = vector.multi_reduction <add>, %67, %cst_33 [1] : vector<2x5xf32> to vector<2xf32>
    %70 = vector.shape_cast %69 : vector<2xf32> to vector<2x1xf32>
    %71 = arith.addf %49, %70 : vector<2x1xf32>
    %72 = vector.extract_strided_slice %19 {offsets = [0, 2, 0], sizes = [2, 3, 128], strides = [1, 1, 1]} : vector<2x5x128xf32> to vector<2x3x128xf32>
    %73 = vector.extract_strided_slice %19 {offsets = [0, 0, 0], sizes = [2, 2, 128], strides = [1, 1, 1]} : vector<2x5x128xf32> to vector<2x2x128xf32>
    %74 = tpu.concatenate %72, %73 in 1 : vector<2x3x128xf32>, vector<2x2x128xf32> -> vector<2x5x128xf32>
    %75 = vector.extract_strided_slice %27 {offsets = [0, 2], sizes = [2, 3], strides = [1, 1]} : vector<2x5xf32> to vector<2x3xf32>
    %76 = vector.extract_strided_slice %27 {offsets = [0, 0], sizes = [2, 2], strides = [1, 1]} : vector<2x5xf32> to vector<2x2xf32>
    %77 = tpu.concatenate %75, %76 in 1 : vector<2x3xf32>, vector<2x2xf32> -> vector<2x5xf32>
    %78 = arith.addf %19, %74 : vector<2x5x128xf32>
    %cst_34 = arith.constant 5.000000e-01 : f32
    %79 = vector.broadcast %cst_34 : f32 to vector<2x5x128xf32>
    %80 = arith.mulf %79, %78 : vector<2x5x128xf32>
    %cst_35 = arith.constant 1.000000e-10 : f32
    %81 = vector.broadcast %cst_35 : f32 to vector<2x5x128xf32>
    %82 = arith.addf %80, %81 : vector<2x5x128xf32>
    %83 = math.log %82 : vector<2x5x128xf32>
    %84 = arith.mulf %80, %83 : vector<2x5x128xf32>
    %cst_36 = arith.constant dense<0.000000e+00> : vector<2x5xf32>
    %85 = vector.multi_reduction <add>, %84, %cst_36 [2] : vector<2x5x128xf32> to vector<2x5xf32>
    %86 = arith.addf %27, %77 : vector<2x5xf32>
    %cst_37 = arith.constant 5.000000e-01 : f32
    %87 = vector.broadcast %cst_37 : f32 to vector<2x5xf32>
    %88 = arith.mulf %87, %86 : vector<2x5xf32>
    %89 = arith.subf %88, %85 : vector<2x5xf32>
    %c0_38 = arith.constant 0 : index
    %c15 = arith.constant 15 : index
    %90 = vector.load %arg7[%c0_38, %c15] : memref<2x128xf32, #tpu.memory_space<vmem>>, vector<2x5xf32>
    tpu.vector_store %arg7[%c0_38, %c15], %89 {strides = array<i32>} : memref<2x128xf32, #tpu.memory_space<vmem>>, vector<2x5xf32>,
    %cst_39 = arith.constant dense<0.000000e+00> : vector<2xf32>
    %91 = vector.multi_reduction <add>, %89, %cst_39 [1] : vector<2x5xf32> to vector<2xf32>
    %92 = vector.shape_cast %91 : vector<2xf32> to vector<2x1xf32>
    %93 = arith.addf %71, %92 : vector<2x1xf32>
    %cst_40 = arith.constant dense<0xFF800000> : vector<2x5xf32>
    %94 = vector.multi_reduction <maximumf>, %3, %cst_40 [2] : vector<2x5x16xf32> to vector<2x5xf32>
    %95 = vector.shape_cast %94 : vector<2x5xf32> to vector<2x5x1xf32>
    %96 = vector.broadcast %95 : vector<2x5x1xf32> to vector<2x5x16xf32>
    %97 = arith.subf %3, %96 : vector<2x5x16xf32>
    %98 = math.exp %97 : vector<2x5x16xf32>
    %cst_41 = arith.constant dense<0.000000e+00> : vector<2x5xf32>
    %99 = vector.multi_reduction <add>, %98, %cst_41 [2] : vector<2x5x16xf32> to vector<2x5xf32>
    %100 = vector.shape_cast %99 : vector<2x5xf32> to vector<2x5x1xf32>
    %101 = tpu.reciprocal %100 : vector<2x5x1xf32> -> vector<2x5x1xf32>
    %102 = vector.broadcast %101 : vector<2x5x1xf32> to vector<2x5x16xf32>
    %103 = arith.mulf %98, %102 : vector<2x5x16xf32>
    %cst_42 = arith.constant dense<0xFF800000> : vector<2xf32>
    %104 = vector.multi_reduction <maximumf>, %4, %cst_42 [1] : vector<2x16xf32> to vector<2xf32>
    %105 = vector.shape_cast %104 : vector<2xf32> to vector<2x1xf32>
    %106 = vector.broadcast %105 : vector<2x1xf32> to vector<2x16xf32>
    %107 = arith.subf %4, %106 : vector<2x16xf32>
    %108 = math.exp %107 : vector<2x16xf32>
    %cst_43 = arith.constant dense<0.000000e+00> : vector<2xf32>
    %109 = vector.multi_reduction <add>, %108, %cst_43 [1] : vector<2x16xf32> to vector<2xf32>
    %110 = vector.shape_cast %109 : vector<2xf32> to vector<2x1xf32>
    %111 = tpu.reciprocal %110 : vector<2x1xf32> -> vector<2x1xf32>
    %112 = vector.broadcast %111 : vector<2x1xf32> to vector<2x16xf32>
    %113 = arith.mulf %108, %112 : vector<2x16xf32>
    %114 = vector.shape_cast %113 : vector<2x16xf32> to vector<2x1x16xf32>
    %115 = vector.broadcast %114 : vector<2x1x16xf32> to vector<2x5x16xf32>
    %116 = arith.subf %103, %115 : vector<2x5x16xf32>
    %117 = math.absf %116 : vector<2x5x16xf32>
    %cst_44 = arith.constant dense<0.000000e+00> : vector<2x5xf32>
    %118 = vector.multi_reduction <add>, %117, %cst_44 [2] : vector<2x5x16xf32> to vector<2x5xf32>
    %cst_45 = arith.constant 0.00999999977 : f32
    %119 = vector.broadcast %cst_45 : f32 to vector<2x5xf32>
    %120 = arith.subf %118, %119 : vector<2x5xf32>
    %cst_46 = arith.constant 0.000000e+00 : f32
    %121 = vector.broadcast %cst_46 : f32 to vector<2x5xf32>
    %122 = arith.maximumf %120, %121 : vector<2x5xf32>
    %cst_47 = arith.constant 0.000000e+00 : f32
    %123 = vector.broadcast %cst_47 : f32 to vector<2x5xf32>
    %124 = arith.subf %123, %48 : vector<2x5xf32>
    %cst_48 = arith.constant 5.000000e+02 : f32
    %125 = vector.broadcast %cst_48 : f32 to vector<2x5xf32>
    %126 = arith.mulf %125, %122 : vector<2x5xf32>
    %127 = arith.addf %124, %126 : vector<2x5xf32>
    %cst_49 = arith.constant dense<0.000000e+00> : vector<2xf32>
    %128 = vector.multi_reduction <add>, %127, %cst_49 [1] : vector<2x5xf32> to vector<2xf32>
    %129 = vector.shape_cast %128 : vector<2xf32> to vector<2x1xf32>
    %cst_50 = arith.constant 2.000000e+00 : f32
    %130 = vector.broadcast %cst_50 : f32 to vector<2x1xf32>
    %131 = arith.mulf %130, %93 : vector<2x1xf32>
    %cst_51 = arith.constant 2.500000e+01 : f32
    %132 = vector.broadcast %cst_51 : f32 to vector<2x1xf32>
    %133 = arith.divf %131, %132 : vector<2x1xf32>
    %134 = arith.subf %129, %133 : vector<2x1xf32>
    %c0_52 = arith.constant 0 : index
    %c0_53 = arith.constant 0 : index
    %135 = vector.load %arg7[%c0_52, %c0_53] : memref<2x128xf32, #tpu.memory_space<vmem>>, vector<2x5xf32>
    tpu.vector_store %arg7[%c0_52, %c0_53], %48 {strides = array<i32>} : memref<2x128xf32, #tpu.memory_space<vmem>>, vector<2x5xf32>,
    %c0_54 = arith.constant 0 : index
    %c5 = arith.constant 5 : index
    %136 = vector.load %arg7[%c0_54, %c5] : memref<2x128xf32, #tpu.memory_space<vmem>>, vector<2x5xf32>
    tpu.vector_store %arg7[%c0_54, %c5], %122 {strides = array<i32>} : memref<2x128xf32, #tpu.memory_space<vmem>>, vector<2x5xf32>,
    %c0_55 = arith.constant 0 : index
    %c20 = arith.constant 20 : index
    %137 = vector.load %arg7[%c0_55, %c20] : memref<2x128xf32, #tpu.memory_space<vmem>>, vector<2x1xf32>
    tpu.vector_store %arg7[%c0_55, %c20], %134 {strides = array<i32>} : memref<2x128xf32, #tpu.memory_space<vmem>>, vector<2x1xf32>,
    return
  }
  func.func @transform_0(%arg0: i32) -> (i32, i32, i32) {
    %c0_i32 = arith.constant 0 : i32
    %c0_i32_0 = arith.constant 0 : i32
    %c0_i32_1 = arith.constant 0 : i32
    return %arg0, %c0_i32, %c0_i32_0 : i32, i32, i32
  }
  func.func @transform_1(%arg0: i32) -> (i32, i32) {
    %c0_i32 = arith.constant 0 : i32
    %c0_i32_0 = arith.constant 0 : i32
    return %arg0, %c0_i32 : i32, i32
  }
  func.func @transform_2(%arg0: i32) -> (i32, i32) {
    %c0_i32 = arith.constant 0 : i32
    %c0_i32_0 = arith.constant 0 : i32
    return %arg0, %c0_i32 : i32, i32
  }
  func.func @transform_3(%arg0: i32) -> (i32, i32, i32) {
    %c0_i32 = arith.constant 0 : i32
    %c0_i32_0 = arith.constant 0 : i32
    %c0_i32_1 = arith.constant 0 : i32
    return %arg0, %c0_i32, %c0_i32_0 : i32, i32, i32
  }
  func.func @transform_4(%arg0: i32) -> (i32, i32) {
    %c0_i32 = arith.constant 0 : i32
    %c0_i32_0 = arith.constant 0 : i32
    return %arg0, %c0_i32 : i32, i32
  }
  func.func @transform_5(%arg0: i32) -> (i32, i32, i32) {
    %c0_i32 = arith.constant 0 : i32
    %c0_i32_0 = arith.constant 0 : i32
    %c0_i32_1 = arith.constant 0 : i32
    return %arg0, %c0_i32, %c0_i32_0 : i32, i32, i32
  }
  func.func @transform_6(%arg0: i32) -> (i32, i32) {
    %c0_i32 = arith.constant 0 : i32
    %c0_i32_0 = arith.constant 0 : i32
    return %arg0, %c0_i32 : i32, i32
  }
}

</mosaic_0001>

<bundles_post_ra>
// kernel: tpu_custom_call.1
= control target key start
LH: loop header
LB: loop body
LE: loop exit
PB: predicated region body
PF: predicated region fallthrough
CT: control target
= control target key end

     0   :  { %v42_v0 = vlaneseq  ;;  %vm435_vm0 = vcmask 123904   ;;  %v650_v3 = vmov 1966171168   ;;  %vm412_vm1 = vcmask 126976   ;;  %s875_s0 = inlined_call_operand.vmem [shape: f32[2,5,128], index: 0, kind: input, shape index: {}]   ;;  %s876_s1 = inlined_call_operand.vmem [shape: f32[2,128], index: 1, kind: input, shape index: {}]   ;;  %s877_s2 = inlined_call_operand.vmem [shape: f32[2,128], index: 2, kind: input, shape index: {}]   ;;  %s878_s3 = inlined_call_operand.vmem [shape: f32[2,5,16], index: 3, kind: input, shape index: {}]   ;;  %s879_s4 = inlined_call_operand.vmem [shape: f32[2,16], index: 4, kind: input, shape index: {}]   ;;  %s880_s5 = inlined_call_operand.vmem [shape: f32[2,5,128], index: 5, kind: output, shape index: {0}]   ;;  %s881_s6 = inlined_call_operand.hbm [shape: f32[2,128], index: 6, kind: output, shape index: {1}]  }
   0x1   :  { %v579_v1 = vld.sshfl [vmem:[%s876_s1] sm:$0x11 pattern:$0x75316420]  ;;  %v40_v4 = vunpack.c.l.s4 %v650_v3 }
   0x2   :  { %v29_v2 = vld [vmem:[%s879_s4] sm:$0x3]  ;;  %v696_v5 = vshrl.u32 %v42_v0, 7 }
   0x3   :  { %v436_v6 = vsel %vm435_vm0, %v29_v2, -inf  ;;  %v27_v7 = vld [vmem:[%s878_s3] sm:$0x1f] }
   0x4   :  { %437 = vmax.xlane.f32.xlu1 %v436_v6 }
   0x5   :  { %12 = vsyncpa [#allocation3], 0  ;;  %v38_v8 = vcombine.high %v579_v1, %v579_v1  ;;  %v41_v9 = vunpack.c.0.s8 %v40_v4  ;;  %v413_v10 = vsel %vm412_vm1, %v27_v7, -inf  ;;  %v708_v13 = vsub.s32 0, %v696_v5  ;;  %v23_v17 = vld [vmem:[%s875_s0] sm:$0x1f] }
   0x6   :  { %v24_v18 = vld [vmem:[%s875_s0 + $0x8] sm:$0x1f]  ;;  %vm71_vm2 = vcmask 1044480   ;;  %v739_v52 = vld [vmem:[%s877_s2] sm:$0x3]  ;;  %vm197_vm3 = vcmask 1043456  }
   0x7   :  { %v704_v11 = vsub.s32 %v41_v9, %v696_v5  ;;  %v28_v25 = vld [vmem:[%s878_s3 + $0x8] sm:$0x1f]  ;;  %v111_v59 = vadd.f32 1e-10, %v739_v52  ;;  %vm308_vm4 = vcmask 1042432   ;;  %vm115_vm5 = vcmask 1041408  }
   0x8   :  { %414 = vmax.xlane.f32.xlu1 %v413_v10  ;;  %v416_v26 = vsel %vm412_vm1, %v28_v25, -inf  ;;  %vm213_vm6 = vcmask 1042434   ;;  %vm220_vm7 = vcmask 31744   ;;  %vm320_vm8 = vcmask 1043459  }
   0x9   :  { %v45_v12 = vrot.slane %v579_v1, %v704_v11  ;;  %v52_v14 = vrot.slane %v38_v8, %v704_v11  ;;  %v126_v54 = vrot.slane %v739_v52, %v704_v11  ;;  %vm334_vm9 = vcmask 23552  }
   0xa   :  { %vm280_vm10 = vcmask 1041409   ;;  %vm283_vm11 = vcmask 115792   ;;  %vm396_vm12 = vcmask 156792   ;;  %vm295_vm13 = vcmask 33792  }
   0xb   :  { %v55_v15 = vmul.f32 -1e+30, %v45_v12  ;;  %v56_v16 = vmul.f32 -1e+30, %v52_v14  ;;  %v134_v57 = vrot.slane %v126_v54, %v704_v11  ;;  %v127_v58 = vcombine.high %v126_v54, %v126_v54 }
   0xc   :  { %vm557_vm14 = vcmask 74792   ;;  %vm559_vm15 = vcmask 165024  }
   0xd   :  { %v62_v19 = vrot.slane %v55_v15, %v708_v13  ;;  %v66_v20 = vrot.slane %v56_v16, %v708_v13  ;;  %v145_v61 = vrot.slane %v134_v57, %v708_v13  ;;  %v141_v63 = vrot.slane %v127_v58, %v704_v11 }
   0xf   :  { %v69_v21 = vadd.f32 %v62_v19, %v23_v17  ;;  %v70_v22 = vadd.f32 %v66_v20, %v24_v18  ;;  %v149_v9 = vrot.slane %v141_v63, %v708_v13 }
  0x11   :  { %v72_v23 = vsel %vm71_vm2, %v69_v21, -inf  ;;  %v75_v24 = vsel %vm71_vm2, %v70_v22, -inf }
  0x12   :  { %73 = vmax.xlane.f32.xlu0 %v72_v23 }
  0x16   :  { %76 = vmax.xlane.f32.xlu0 %v75_v24 }
  0x1a   :  { %417 = vmax.xlane.f32.xlu0 %v416_v26 }
  0x91   :  { %v438_v27 = vpop.xlane.xlu1 %437 }
  0x92   :  { %v439_v28 = vsub.f32 %v29_v2, %v438_v27 }
  0x94   :  { %v440_v31 = vmul.f32 1.442695, %v439_v28 }
  0x95   :  { %v415_v29 = vpop.xlane.xlu1 %414 }
  0x96   :  { %v419_v32 = vsub.f32 %v27_v7, %v415_v29  ;;  %588 = vpow2.f32 %v440_v31 }
  0x98   :  { %v421_v36 = vmul.f32 1.442695, %v419_v32 }
  0x9f   :  { %v74_v30 = vpop.xlane.xlu0 %73 }
  0xa0   :  { %v78_v33 = vsub.f32 %v69_v21, %v74_v30  ;;  %v589_v42 = vpop.eup %588 }
  0xa1   :  { %v442_v46 = vsel %vm435_vm0, %v589_v42, 0.0 }
  0xa2   :  { %v80_v34 = vmul.f32 1.442695, %v78_v33 }
  0xa3   :  { %v77_v35 = vpop.xlane.xlu0 %76 }
  0xa4   :  { %590 = vpow2.f32 %v80_v34  ;;  %v79_v37 = vsub.f32 %v70_v22, %v77_v35 }
  0xa5   :  { %592 = vpow2.f32 %v421_v36 }
  0xa6   :  { %v82_v38 = vmul.f32 1.442695, %v79_v37 }
  0xa7   :  { %v418_v39 = vpop.xlane.xlu0 %417 }
  0xa8   :  { %594 = vpow2.f32 %v82_v38  ;;  %v420_v40 = vsub.f32 %v28_v25, %v418_v39 }
  0xaa   :  { %v423_v41 = vmul.f32 1.442695, %v420_v40 }
  0xac   :  { %596 = vpow2.f32 %v423_v41 }
  0xae   :  { %v591_v43 = vpop.eup %590 }
  0xaf   :  { %v84_v44 = vsel %vm71_vm2, %v591_v43, 0.0  ;;  %v726_v45 = vpop.eup %592 }
  0xb0   :  { %85 = vadd.xlane.f32.xlu1 %v84_v44  ;;  %v425_v49 = vsel %vm412_vm1, %v726_v45, 0.0 }
  0xb2   :  { %v595_v47 = vpop.eup %594 }
  0xb3   :  { %v87_v48 = vsel %vm71_vm2, %v595_v47, 0.0 }
  0xb4   :  { %443 = vadd.xlane.f32.xlu1 %v442_v46  ;;  %88 = vadd.xlane.f32.xlu0 %v87_v48 }
  0xb6   :  { %v732_v50 = vpop.eup %596 }
  0xb7   :  { %v428_v51 = vsel %vm412_vm1, %v732_v50, 0.0 }
  0xb8   :  { %426 = vadd.xlane.f32.xlu0 %v425_v49  ;;  %429 = vadd.xlane.f32.xlu1 %v428_v51 }
 0x13d   :  { %v86_v53 = vpop.xlane.xlu1 %85 }
 0x13e   :  { %598 = vrcp.f32 %v86_v53 }
 0x141   :  { %v444_v55 = vpop.xlane.xlu1 %443  ;;  %v89_v56 = vpop.xlane.xlu0 %88 }
 0x142   :  { %600 = vrcp.f32 %v444_v55 }
 0x143   :  { %602 = vrcp.f32 %v89_v56 }
 0x144   :  { %604 = vlog2.f32 %v111_v59 }
 0x145   :  { %v430_v60 = vpop.xlane.xlu1 %429  ;;  %v427_v2 = vpop.xlane.xlu0 %426 }
 0x146   :  { %606 = vrcp.f32 %v430_v60 }
 0x147   :  { %608 = vrcp.f32 %v427_v2 }
 0x148   :  { %v599_v62 = vpop.eup %598 }
 0x149   :  { %v747_v1 = vmul.f32 %v599_v62, %v591_v43 }
 0x14b   :  { %94 = vst [vmem:[%s880_s5] sm:$0x1f] %v747_v1  ;;  %v97_v3 = vadd.f32 1e-10, %v747_v1  ;;  %v152_v4 = vadd.f32 %v145_v61, %v747_v1  ;;  %v189_v6 = vrot.slane %v747_v1, 1  ;;  %v193_v7 = vrot.slane %v747_v1, 4 }
 0x14c   :  { %v601_v8 = vpop.eup %600  ;;  %v300_v10 = vrot.slane %v747_v1, 2  ;;  %v304_v12 = vrot.slane %v747_v1, 5 }
 0x14d   :  { %v603_v14 = vpop.eup %602  ;;  %v446_v15 = vmul.f32 %v601_v8, %v589_v42  ;;  %610 = vlog2.f32 %v97_v3  ;;  %v760_v16 = vmul.f32 0.5, %v152_v4  ;;  %v198_v17 = vsel %vm197_vm3, %v189_v6, %v193_v7 }
 0x14e   :  { %v93_v18 = vmul.f32 %v603_v14, %v595_v47  ;;  %v309_v19 = vsel %vm308_vm4, %v300_v10, %v304_v12  ;;  %v222_v22 = vadd.f32 %v198_v17, %v747_v1  ;;  %v605_v32 = vpop.eup %604 }
 0x14f   :  { %v454_v20 = vrot.slane %v446_v15, %v704_v11  ;;  %v171_v21 = vadd.f32 1e-10, %v760_v16  ;;  %v336_v23 = vadd.f32 %v309_v19, %v747_v1  ;;  %v113_v44 = vmul.f32 0.6931472, %v605_v32 }
 0x150   :  { %95 = vst [vmem:[%s880_s5 + $0x8] sm:$0x1f] %v93_v18  ;;  %v98_v24 = vadd.f32 1e-10, %v93_v18  ;;  %v153_v25 = vadd.f32 %v149_v9, %v93_v18  ;;  %v190_v26 = vrot.slane %v93_v18, 1  ;;  %v194_v27 = vrot.slane %v93_v18, 4  ;;  %v607_v36 = vpop.eup %606 }
 0x151   :  { %v455_v28 = vcombine.high %v454_v20, %v454_v20  ;;  %v462_v29 = vrot.slane %v454_v20, %v704_v11  ;;  %v774_v35 = vmul.f32 0.5, %v222_v22  ;;  %v301_v38 = vrot.slane %v93_v18, 2  ;;  %v609_v43 = vpop.eup %608  ;;  %s653_s5 = smov [#allocation2]  }
 0x152   :  { %612 = vlog2.f32 %v98_v24  ;;  %v155_v30 = vmul.f32 0.5, %v153_v25  ;;  %v199_v31 = vsel %vm197_vm3, %v190_v26, %v194_v27  ;;  %v305_v39 = vrot.slane %v93_v18, 5  ;;  %s569_s10 = sshll.u32 %s653_s5, 4  ;;  %s570_s10 = int_to_ptr.vmem [resolvable:$true] %s569_s10 }
 0x153   :  { %v469_v33 = vrot.slane %v455_v28, %v704_v11  ;;  %614 = vlog2.f32 %v171_v21  ;;  %v223_v34 = vadd.f32 %v199_v31, %v93_v18  ;;  %v776_v40 = vmul.f32 0.5, %v336_v23  ;;  %s626_s11 = scalar_lea.vmem %s570_s10, 32  ;;  %p631_p1 = scmp.lt.s32.totalorder %s570_s10, %s570_s10 }
 0x154   :  { %v172_v37 = vadd.f32 1e-10, %v155_v30  ;;  %v226_v42 = vadd.f32 1e-10, %v774_v35  ;;  %v310_v46 = vsel %vm308_vm4, %v301_v38, %v305_v39  ;;  %v473_v48 = vrot.slane %v462_v29, %v708_v13  ;;  %p627_p0 = scmp.ne.s32.totalorder %s570_s10, %s626_s11  ;;  %p632_p2 = scmp.lt.s32.totalorder %s626_s11, %s626_s11 }
 0x155   :  { %v225_v41 = vmul.f32 0.5, %v223_v34  ;;  %v477_v11 = vrot.slane %v469_v33, %v708_v13  ;;  %v337_v53 = vadd.f32 %v310_v46, %v93_v18  ;;  %v340_v54 = vadd.f32 1e-10, %v776_v40 }
 0x156   :  { %616 = vlog2.f32 %v172_v37  ;;  %v433_v55 = vmul.f32 %v609_v43, %v726_v45  ;;  %v114_v57 = vmul.f32 %v113_v44, %v739_v52  ;;  %v434_v58 = vmul.f32 %v607_v36, %v732_v50  ;;  %p633_p3 = por %p632_p2, %p631_p1 }
 0x157   :  { %v611_v47 = vpop.eup %610  ;;  %v227_v49 = vadd.f32 1e-10, %v225_v41  ;;  %618 = vlog2.f32 %v226_v42  ;;  %v339_v59 = vmul.f32 0.5, %v337_v53  ;;  %v801_v34 = vand.u32 127, %v42_v0 }
 0x158   :  { %v100_v51 = vmul.f32 0.6931472, %v611_v47  ;;  %v480_v60 = vsub.f32 %v433_v55, %v473_v48  ;;  %v481_v63 = vsub.f32 %v434_v58, %v477_v11  ;;  %v116_v45 = vsel %vm115_vm5, %v114_v57, 0.0  ;;  %p634_p4 = pnand %p633_p3, %p627_p0 }
 0x159   :  { %620 = vlog2.f32 %v227_v49  ;;  %v341_v2 = vadd.f32 1e-10, %v339_v59  ;;  %v311_v36 = vadd.s32 2, %v801_v34  ;;  %v323_v37 = vadd.s32 4294967293, %v801_v34 }
 0x15a   :  { %v103_v56 = vmul.f32 %v100_v51, %v747_v1  ;;  %622 = vlog2.f32 %v340_v54  ;;  %v483_v7 = vand.u32 2147483647, %v481_v63  ;;  %v482_v52 = vand.u32 2147483647, %v480_v60 }
 0x15b   :  { %624 = vlog2.f32 %v341_v2  ;;  %v546_v42 = vadd.s32 4294967291, %v801_v34  ;;  %v250_v0 = vsub.s32 2, %v696_v5  ;;  %v163_v55 = vsub.s32 1, %v696_v5 }
 0x15c   :  { %v613_v61 = vpop.eup %612  ;;  %v105_v62 = vsel %vm71_vm2, %v103_v56, 0.0  ;;  %v487_v14 = vsel %vm412_vm1, %v483_v7, 0.0  ;;  %v484_v19 = vsel %vm412_vm1, %v482_v52, 0.0 }
 0x15d   :  { %v615_v3 = vpop.eup %614  ;;  %106 = vadd.xlane.f32.xlu0 %v105_v62  ;;  %v102_v4 = vmul.f32 0.6931472, %v613_v61  ;;  %v651_v61 = vmov 0   ;;  %v549_v62 = vsub.s32 %v546_v42, %v696_v5 }
 0x15e   :  { %v174_v9 = vmul.f32 0.6931472, %v615_v3  ;;  %587 = vset.pattern.permute.xlu0 %v651_v61  ;;  %586 = vset.pattern.permute.xlu1 %v651_v61 }
 0x15f   :  { %v104_v6 = vmul.f32 %v102_v4, %v93_v18 }
 0x160   :  { %v617_v1 = vpop.eup %616  ;;  %v177_v18 = vmul.f32 %v174_v9, %v760_v16 }
 0x161   :  { %117 = vadd.xlane.f32.xlu0 %v116_v45  ;;  %v108_v50 = vsel %vm71_vm2, %v104_v6, 0.0  ;;  %v176_v8 = vmul.f32 0.6931472, %v617_v1  ;;  %v619_v10 = vpop.eup %618 }
 0x162   :  { %109 = vadd.xlane.f32.xlu1 %v108_v50  ;;  %v229_v20 = vmul.f32 0.6931472, %v619_v10  ;;  %v179_v25 = vsel %vm71_vm2, %v177_v18, 0.0  ;;  %v364_v10 = vsub.s32 3, %v696_v5 }
 0x163   :  { %v621_v12 = vpop.eup %620  ;;  %v178_v15 = vmul.f32 %v176_v8, %v155_v30 }
 0x164   :  { %v231_v17 = vmul.f32 0.6931472, %v621_v12  ;;  %v623_v21 = vpop.eup %622  ;;  %v232_v26 = vmul.f32 %v229_v20, %v774_v35  ;;  %v204_v35 = vadd.s32 1, %v801_v34 }
 0x165   :  { %488 = vadd.xlane.f32.xlu0 %v487_v14  ;;  %v625_v22 = vpop.eup %624  ;;  %v182_v23 = vsel %vm71_vm2, %v178_v15, 0.0  ;;  %v343_v28 = vmul.f32 0.6931472, %v623_v21 }
 0x166   :  { %485 = vadd.xlane.f32.xlu1 %v484_v19  ;;  %v233_v24 = vmul.f32 %v231_v17, %v225_v41  ;;  %v345_v27 = vmul.f32 0.6931472, %v625_v22  ;;  %v234_v16 = vsel %vm71_vm2, %v232_v26, 0.0  ;;  %v207_v39 = vsub.s32 %v204_v35, %v696_v5 }
 0x167   :  { %v346_v31 = vmul.f32 %v343_v28, %v776_v40  ;;  %v314_v40 = vsub.s32 %v311_v36, %v696_v5  ;;  %v326_v41 = vsub.s32 %v323_v37, %v696_v5 }
 0x168   :  { %v237_v29 = vsel %vm71_vm2, %v233_v24, 0.0  ;;  %v347_v30 = vmul.f32 %v345_v27, %v339_v59 }
 0x169   :  { %183 = vadd.xlane.f32.xlu0 %v182_v23  ;;  %v348_v33 = vsel %vm71_vm2, %v346_v31, 0.0 }
 0x16a   :  { %180 = vadd.xlane.f32.xlu1 %v179_v25  ;;  %v351_v32 = vsel %vm71_vm2, %v347_v30, 0.0 }
 0x16d   :  { %238 = vadd.xlane.f32.xlu0 %v237_v29 }
 0x16e   :  { %235 = vadd.xlane.f32.xlu1 %v234_v16 }
 0x171   :  { %352 = vadd.xlane.f32.xlu0 %v351_v32 }
 0x172   :  { %349 = vadd.xlane.f32.xlu1 %v348_v33 }
 0x1ea   :  { %v806_v38 = vpop.xlane.xlu0 %106 }
 0x1eb   :  { %v208_v46 = vrot.slane %v806_v38, %v207_v39  ;;  %v216_v47 = vrot.slane %v806_v38, 7  ;;  %v315_v11 = vrot.slane %v806_v38, %v314_v40  ;;  %v327_v48 = vrot.slane %v806_v38, %v326_v41 }
 0x1ee   :  { %v118_v43 = vpop.xlane.xlu0 %117 }
 0x1ef   :  { %v813_v44 = vpop.xlane.xlu1 %109  ;;  %v160_v20 = vrot.slane %v118_v43, %v708_v13  ;;  %v164_v24 = vrot.slane %v118_v43, %v163_v55  ;;  %v652_v43 = vmov 0.0  }
 0x1f0   :  { %v212_v49 = vrot.slane %v813_v44, %v207_v39  ;;  %v217_v51 = vrot.slane %v813_v44, 6  ;;  %v319_v53 = vrot.slane %v813_v44, %v314_v40  ;;  %v331_v54 = vrot.slane %v813_v44, %v326_v41  ;;  %96 = vst [vmem:[#allocation2] sm:$0x3] %v652_v43 }
 0x1f1   :  { %v167_v21 = vadd.f32 %v160_v20, %v806_v38  ;;  %v168_v16 = vadd.f32 %v164_v24, %v813_v44 }
 0x1f2   :  { %v489_v56 = vpop.xlane.xlu0 %488  ;;  %v214_v57 = vsel %vm213_vm6, %v212_v49, %v208_v46  ;;  %v218_v58 = vsel %vm213_vm6, %v217_v51, %v216_v47  ;;  %v321_v59 = vsel %vm320_vm8, %v319_v53, %v315_v11  ;;  %v332_v60 = vsel %vm320_vm8, %v331_v54, %v327_v48 }
 0x1f3   :  { %v486_v63 = vpop.xlane.xlu1 %485  ;;  %v581_v2 = vadd.f32 -0.01, %v489_v56  ;;  %v221_v3 = vsel %vm220_vm7, %v214_v57, %v218_v58  ;;  %v335_v7 = vsel %vm334_vm9, %v321_v59, %v332_v60  ;;  %v169_v25 = vmul.f32 0.5, %v167_v21 }
 0x1f4   :  { %v580_v4 = vadd.f32 -0.01, %v486_v63  ;;  %v251_v45 = vrot.slane %v221_v3, %v250_v0  ;;  %v244_v6 = vrot.slane %v221_v3, %v163_v55  ;;  %v358_v9 = vrot.slane %v335_v7, %v250_v0 }
 0x1f5   :  { %v493_v1 = vmax.f32 %v581_v2, 0.0  ;;  %v365_v14 = vrot.slane %v335_v7, %v364_v10  ;;  %v170_v40 = vmul.f32 0.5, %v168_v16  ;;  %v271_v54 = vadd.s32 4294967286, %v801_v34 }
 0x1f6   :  { %v492_v52 = vmax.f32 %v580_v4, 0.0  ;;  %253 = vbcast.lane.b32.xlu0 %v251_v45, 256  ;;  %246 = vbcast.lane.b32.xlu1 %v244_v6, 256  ;;  %v184_v17 = vpop.xlane.xlu0 %183  ;;  %v287_v63 = vsub.s32 %v801_v34, %v696_v5 }
 0x1f7   :  { %v554_v50 = vrot.slane %v493_v1, %v549_v62  ;;  %v181_v15 = vpop.xlane.xlu1 %180  ;;  %v186_v0 = vsub.f32 %v170_v40, %v184_v17  ;;  %v497_v53 = vmul.f32 500.0, %v493_v1  ;;  %v274_v55 = vsub.s32 %v271_v54, %v696_v5 }
 0x1f8   :  { %v550_v8 = vrot.slane %v492_v52, %v549_v62  ;;  %v837_v28 = vsub.f32 %v169_v25, %v181_v15  ;;  %v496_v39 = vmul.f32 500.0, %v492_v52 }
 0x1f9   :  { %v495_v49 = vsub.f32 0.0, %v186_v0 }
 0x1fa   :  { %360 = vbcast.lane.b32.xlu1 %v358_v9, 256  ;;  %v833_v12 = vsel %vm280_vm10, %v554_v50, %v550_v8  ;;  %v239_v18 = vpop.xlane.xlu0 %238  ;;  %v494_v13 = vsub.f32 0.0, %v837_v28 }
 0x1fb   :  { %v236_v19 = vpop.xlane.xlu1 %235 }
 0x1fc   :  { %v498_v11 = vadd.f32 %v496_v39, %v494_v13 }
 0x1fe   :  { %367 = vbcast.lane.b32.xlu1 %v365_v14, 256  ;;  %v353_v23 = vpop.xlane.xlu0 %352 }
 0x1ff   :  { %v350_v22 = vpop.xlane.xlu1 %349 }
 0x268   :  { %v247_v26 = vpop.permute.xlu1 %246  ;;  %v254_v27 = vpop.permute.xlu0 %253 }
 0x269   :  { %v257_v29 = vadd.f32 %v247_v26, %v806_v38  ;;  %v258_v30 = vadd.f32 %v254_v27, %v813_v44 }
 0x26b   :  { %v259_v31 = vmul.f32 0.5, %v257_v29  ;;  %v260_v32 = vmul.f32 0.5, %v258_v30 }
 0x26c   :  { %v361_v33 = vpop.permute.xlu1 %360 }
 0x26d   :  { %v261_v35 = vsub.f32 %v259_v31, %v236_v19  ;;  %v262_v36 = vsub.f32 %v260_v32, %v239_v18  ;;  %v371_v37 = vadd.f32 %v361_v33, %v806_v38  ;;  %v499_v38 = vadd.f32 %v497_v53, %v495_v49 }
 0x26f   :  { %v373_v41 = vmul.f32 0.5, %v371_v37  ;;  %266 = vperm.xlu1 %586, %v261_v35   ;;  %269 = vperm.xlu0 %587, %v262_v36  }
 0x270   :  { %v368_v42 = vpop.permute.xlu1 %367 }
 0x271   :  { %v375_v46 = vsub.f32 %v373_v41, %v350_v22  ;;  %v372_v47 = vadd.f32 %v368_v42, %v813_v44  ;;  %v385_v44 = vadd.s32 4294967281, %v801_v34 }
 0x273   :  { %v374_v48 = vmul.f32 0.5, %v372_v47  ;;  %380 = vperm.xlu1 %586, %v375_v46   ;;  %503 = vperm.xlu0 %587, %v498_v11   ;;  %v388_v62 = vsub.s32 %v385_v44, %v696_v5 }
 0x275   :  { %v376_v51 = vsub.f32 %v374_v48, %v353_v23 }
 0x277   :  { %383 = vperm.xlu1 %586, %v376_v51  }
 0x27b   :  { %506 = vperm.xlu1 %586, %v499_v38  }
 0x2ee   :  { %v267_v56 = vpop.permute.xlu1 %266  ;;  %v270_v57 = vpop.permute.xlu0 %269 }
 0x2ef   :  { %v275_v58 = vrot.slane %v267_v56, %v274_v55  ;;  %v279_v59 = vrot.slane %v270_v57, %v274_v55  ;;  %v288_v9 = vrot.slane %v267_v56, %v287_v63  ;;  %v292_v10 = vrot.slane %v270_v57, %v287_v63 }
 0x2f1   :  { %v281_v60 = vsel %vm280_vm10, %v279_v59, %v275_v58  ;;  %v293_v17 = vsel %vm280_vm10, %v292_v10, %v288_v9 }
 0x2f2   :  { %284 = vst.msk [vmem:[#allocation2] sm:$0x3] %vm283_vm11, %v281_v60  ;;  %v381_v61 = vpop.permute.xlu1 %380  ;;  %v504_v1 = vpop.permute.xlu0 %503  ;;  %v296_v19 = vsel %vm295_vm13, %v293_v17, 0.0 }
 0x2f3   :  { %v389_v3 = vrot.slane %v381_v61, %v388_v62  ;;  %v401_v4 = vrot.slane %v381_v61, %v287_v63  ;;  %v511_v14 = vrot.slane %v504_v1, %v287_v63 }
 0x2f6   :  { %v384_v2 = vpop.permute.xlu1 %383 }
 0x2f7   :  { %v393_v45 = vrot.slane %v384_v2, %v388_v62  ;;  %v405_v6 = vrot.slane %v384_v2, %v287_v63 }
 0x2f9   :  { %v394_v7 = vsel %vm280_vm10, %v393_v45, %v389_v3  ;;  %v406_v52 = vsel %vm280_vm10, %v405_v6, %v401_v4 }
 0x2fa   :  { %v507_v50 = vpop.permute.xlu1 %506  ;;  %v408_v8 = vsel %vm295_vm13, %v406_v52, 0.0  ;;  %397 = vst.msk [vmem:[#allocation2] sm:$0x3] %vm396_vm12, %v394_v7 }
 0x2fb   :  { %v515_v5 = vrot.slane %v507_v50, %v287_v63  ;;  %409 = vadd.xlane.f32.xlu1 %v408_v8 }
 0x2fd   :  { %v516_v34 = vsel %vm280_vm10, %v515_v5, %v511_v14 }
 0x2fe   :  { %v518_v15 = vsel %vm295_vm13, %v516_v34, 0.0 }
 0x2ff   :  { %519 = vadd.xlane.f32.xlu0 %v518_v15 }
 0x303   :  { %297 = vadd.xlane.f32.xlu0 %v296_v19 }
 0x30c   :  { %531 = vperm.xlu1 %586, %v186_v0  }
 0x319   :  { %528 = vperm.xlu0 %587, %v837_v28  }
 0x388   :  { %v410_v20 = vpop.xlane.xlu1 %409 }
 0x38c   :  { %v520_v18 = vpop.xlane.xlu0 %519  ;;  %v532_v24 = vpop.permute.xlu1 %531 }
 0x38d   :  { %v540_v27 = vrot.slane %v532_v24, %v287_v63 }
 0x390   :  { %v298_v21 = vpop.xlane.xlu0 %297 }
 0x391   :  { %v411_v22 = vadd.f32 %v410_v20, %v298_v21 }
 0x393   :  { %v521_v23 = vmul.f32 2.0, %v411_v22 }
 0x395   :  { %v523_v25 = vmul.f32 0.04, %v521_v23 }
 0x397   :  { %v524_v16 = vsub.f32 %v520_v18, %v523_v25 }
 0x398   :  { %v529_v26 = vpop.permute.xlu0 %528 }
 0x399   :  { %v536_v29 = vrot.slane %v529_v26, %v287_v63 }
 0x39b   :  { %v541_v30 = vsel %vm280_vm10, %v540_v27, %v536_v29 }
 0x39c   :  { %543 = vst.msk [vmem:[#allocation2] sm:$0x3] %vm295_vm13, %v541_v30 }
 0x39d   :  { %558 = vst.msk [vmem:[#allocation2] sm:$0x3] %vm557_vm14, %v833_v12 }
 0x39e   :  { %560 = vst.msk [vmem:[#allocation2] sm:$0x3] %vm559_vm15, %v524_v16 }
 0x39f   :  { %637 = shalt.err (!%p634_p4)
}
 0x3a0   :  { %s638_s14 = scalar_lea.hbm %s881_s6, 32 }
 0x3a1   :  { %p639_p5 = scmp.ne.s32.totalorder %s881_s6, %s638_s14  ;;  %p642_p6 = scmp.lt.u32.totalorder %s638_s14, %s881_s6 }
 0x3a3   :  { %p644_p7 = pnand %p642_p6, %p639_p5 }
 0x3a5   :  { %647 = shalt.err (!%p644_p7)
}
 0x3a6   :  { %572 = dma.vmem_to_hbm [thread:$0]  %s570_s10, 32, %s881_s6, [#allocation3]  }
 0x3a7   :  { %648 = dma.done.wait [#allocation3], 32  }
 0x3a8   :  { %649 = vsyncadd [#allocation3], 4294967264 }
 0x3a9   :  { %578 = vsyncpa [#allocation3], 1 }

</bundles_post_ra>
